<compile_context>
chip_gen: v5e
topology: v5e:2x2
jax: 0.10.0
libtpu: 0.0.40
codegen_flags: <defaults>
</compile_context>

<pallas_src>
import functools

import jax
import jax.numpy as jnp
from jax import lax
from jax.experimental import pallas as pl
from jax.experimental.pallas import tpu as pltpu

S, B, C = 7, 2, 20
D = C + B * 5              # 30 channels per cell
LAMBDA_NOOBJ = 0.5
LAMBDA_COORD = 5.0

LANE = 128
MAX_TILE_M = 8192          # max cells per grid step (multiple of 128)
MIN_SPLIT_M = 2048         # don't split problems smaller than this per tile


def _yolo_cell_loss(p_cls, p_c1, p_b1, p_c2, p_b2, t_cls, t_obj, t_box):
    """Per-cell YOLOv1 loss, channels-first.

    Shapes: p_cls/t_cls (20, T); p_c1/p_c2/t_obj (1, T); p_b1/p_b2/t_box (4, T).
    Returns the (1, T) per-cell weighted loss (exact forward semantics).
    """
    def inter_and_union(pb, tb):
        px1 = pb[0:1] - 0.5 * pb[2:3]
        px2 = pb[0:1] + 0.5 * pb[2:3]
        py1 = pb[1:2] - 0.5 * pb[3:4]
        py2 = pb[1:2] + 0.5 * pb[3:4]
        tx1 = tb[0:1] - 0.5 * tb[2:3]
        tx2 = tb[0:1] + 0.5 * tb[2:3]
        ty1 = tb[1:2] - 0.5 * tb[3:4]
        ty2 = tb[1:2] + 0.5 * tb[3:4]
        iw = jnp.maximum(jnp.minimum(px2, tx2) - jnp.maximum(px1, tx1), 0.0)
        ih = jnp.maximum(jnp.minimum(py2, ty2) - jnp.maximum(py1, ty1), 0.0)
        inter = iw * ih
        union = jnp.abs(pb[2:3] * pb[3:4]) + jnp.abs(tb[2:3] * tb[3:4]) - inter
        return inter, union

    i1, u1 = inter_and_union(p_b1, t_box)
    i2, u2 = inter_and_union(p_b2, t_box)
    # iou2 > iou1  <=>  i2*(u1+eps) > i1*(u2+eps)   (unions >= 0, eps > 0).
    # Strict '>' reproduces torch.max's index-0-on-ties behaviour.
    best = i2 * (u1 + 1e-6) > i1 * (u2 + 1e-6)            # (1, T) bool

    ex = t_obj                                            # exists_box
    ex2 = ex * ex                                         # exact fold of the mask
    no = 1.0 - ex
    no2 = no * no

    blend = jnp.where(best, p_b2, p_b1)                   # (4, T) responsible box

    # ---- box coordinate loss ----
    xy_sq = jnp.sum((blend[0:2] - t_box[0:2]) ** 2, axis=0, keepdims=True)
    wh_p = jnp.sqrt(jnp.abs(ex * blend[2:4] + 1e-6))      # literal spec: no sign()
    wh_t = jnp.sqrt(ex * t_box[2:4])
    wh_sq = jnp.sum((wh_p - wh_t) ** 2, axis=0, keepdims=True)
    box_term = ex2 * xy_sq + wh_sq

    # ---- object / no-object / class losses ----
    pred_conf = jnp.where(best, p_c2, p_c1)               # (1, T)
    obj_sq = (pred_conf - t_obj) ** 2
    noobj_sq = (p_c1 - t_obj) ** 2 + (p_c2 - t_obj) ** 2
    cls_sq = jnp.sum((p_cls - t_cls) ** 2, axis=0, keepdims=True)

    return (LAMBDA_COORD * box_term
            + ex2 * obj_sq
            + LAMBDA_NOOBJ * (no2 * noobj_sq)
            + ex2 * cls_sq)


def _yolo_loss_kernel(pred_ref, tgt_ref, out_ref, *, m_total, tile_m):
    f32 = jnp.float32
    # Static sublane slices of the two channel-major slabs (no wrapper split).
    p_cls = pred_ref[0:20, :].astype(f32)
    p_c1 = pred_ref[20:21, :].astype(f32)
    p_b1 = pred_ref[21:25, :].astype(f32)
    p_c2 = pred_ref[25:26, :].astype(f32)
    p_b2 = pred_ref[26:30, :].astype(f32)
    t_cls = tgt_ref[0:20, :].astype(f32)
    t_obj = tgt_ref[20:21, :].astype(f32)
    t_box = tgt_ref[21:25, :].astype(f32)

    per_cell = _yolo_cell_loss(p_cls, p_c1, p_b1, p_c2, p_b2,
                               t_cls, t_obj, t_box)        # (1, tile_m)

    # Mask lanes past the true number of cells (last block may be ragged;
    # its contents are unspecified, but jnp.where discards any NaN/Inf).
    tile = pl.program_id(0)
    lane_idx = lax.broadcasted_iota(jnp.int32, per_cell.shape, 1)
    valid = (lane_idx + tile * tile_m) < m_total
    per_cell = jnp.where(valid, per_cell, 0.0)

    # Fold the (1, tile_m) per-cell row into a lane-dense (1, 128) partial;
    # the final scalar sum happens once in the wrapper.  Aligned slices only.
    acc = per_cell[:, 0:LANE]
    for k in range(1, tile_m // LANE):
        acc = acc + per_cell[:, k * LANE:(k + 1) * LANE]
    out_ref[...] = acc[None]                               # (1, 1, 128)


def _choose_tiling(m):
    """Pick (tile_m, num_tiles): big tiles; even tile count when enough work."""
    lane_blocks = pl.cdiv(m, LANE)
    max_blocks = MAX_TILE_M // LANE
    min_split_blocks = MIN_SPLIT_M // LANE
    if lane_blocks >= 2 * min_split_blocks:
        num_tiles = max(2, pl.cdiv(lane_blocks, max_blocks))
        if num_tiles % 2:
            num_tiles += 1                                 # v7x: 2-core balance
    else:
        num_tiles = 1                                      # tiny: avoid per-step overhead
    blocks_per_tile = pl.cdiv(lane_blocks, num_tiles)
    tile_m = blocks_per_tile * LANE
    num_tiles = pl.cdiv(lane_blocks, blocks_per_tile)
    return tile_m, num_tiles


def yolo_loss(predictions, target):
    """predictions: (N, S*S*(C+B*5)); target: (N, S, S, C+B*5). Scalar f32 loss."""
    n = target.shape[0]
    m = n * S * S
    tile_m, num_tiles = _choose_tiling(m)

    # Single fused relayout per tensor: reshape (free view) + transpose
    # (+ channel slice for target -- the 5 unused channels are never moved).
    pred_t = predictions.reshape(m, D).T                   # (30, m) channel-major
    tgt_t = target.reshape(m, D)[:, :25].T                 # (25, m) channel-major

    kernel = functools.partial(_yolo_loss_kernel, m_total=m, tile_m=tile_m)

    partials = pl.pallas_call(
        kernel,
        out_shape=jax.ShapeDtypeStruct((num_tiles, 1, LANE), jnp.float32),
        grid=(num_tiles,),
        in_specs=[pl.BlockSpec((30, tile_m), lambda i: (0, i)),
                  pl.BlockSpec((25, tile_m), lambda i: (0, i))],
        out_specs=pl.BlockSpec((1, 1, LANE), lambda i: (i, 0, 0)),
        compiler_params=pltpu.CompilerParams(
            dimension_semantics=("parallel",)),
    )(pred_t, tgt_t)

    return jnp.sum(partials)


def _yolo_loss_reference(predictions, target):
    """Literal pure-JAX port of the PyTorch module (with IoU divides)."""
    pred = predictions.reshape(-1, S, S, D).astype(jnp.float32)
    tgt = target.astype(jnp.float32)

    def iou(b1, b2):
        b1x1 = b1[..., 0:1] - b1[..., 2:3] / 2
        b1y1 = b1[..., 1:2] - b1[..., 3:4] / 2
        b1x2 = b1[..., 0:1] + b1[..., 2:3] / 2
        b1y2 = b1[..., 1:2] + b1[..., 3:4] / 2
        b2x1 = b2[..., 0:1] - b2[..., 2:3] / 2
        b2y1 = b2[..., 1:2] - b2[..., 3:4] / 2
        b2x2 = b2[..., 0:1] + b2[..., 2:3] / 2
        b2y2 = b2[..., 1:2] + b2[..., 3:4] / 2
        x1 = jnp.maximum(b1x1, b2x1)
        y1 = jnp.maximum(b1y1, b2y1)
        x2 = jnp.minimum(b1x2, b2x2)
        y2 = jnp.minimum(b1y2, b2y2)
        inter = jnp.maximum(x2 - x1, 0.0) * jnp.maximum(y2 - y1, 0.0)
        a1 = jnp.abs((b1x2 - b1x1) * (b1y2 - b1y1))
        a2 = jnp.abs((b2x2 - b2x1) * (b2y2 - b2y1))
        return inter / (a1 + a2 - inter + 1e-6)

    iou1 = iou(pred[..., 21:25], tgt[..., 21:25])
    iou2 = iou(pred[..., 26:30], tgt[..., 21:25])
    best = (iou2 > iou1).astype(jnp.float32)
    exists = tgt[..., 20:21]

    box_p = exists * (best * pred[..., 26:30] + (1 - best) * pred[..., 21:25])
    box_t = exists * tgt[..., 21:25]
    box_p_wh = jnp.sqrt(jnp.abs(box_p[..., 2:4] + 1e-6))
    box_t_wh = jnp.sqrt(box_t[..., 2:4])
    box_loss = (jnp.sum((box_p[..., 0:2] - box_t[..., 0:2]) ** 2)
                + jnp.sum((box_p_wh - box_t_wh) ** 2))

    pred_box = best * pred[..., 25:26] + (1 - best) * pred[..., 20:21]
    object_loss = jnp.sum((exists * pred_box - exists * tgt[..., 20:21]) ** 2)

    no = 1 - exists
    no_object_loss = (jnp.sum((no * pred[..., 20:21] - no * tgt[..., 20:21]) ** 2)
                      + jnp.sum((no * pred[..., 25:26] - no * tgt[..., 20:21]) ** 2))

    class_loss = jnp.sum((exists * pred[..., 0:20] - exists * tgt[..., 0:20]) ** 2)

    return (LAMBDA_COORD * box_loss + object_loss
            + LAMBDA_NOOBJ * no_object_loss + class_loss)


if __name__ == "__main__":
    key = jax.random.PRNGKey(0)
    k_pred, k_tgt, k_obj = jax.random.split(key, 3)

    N = 2
    predictions = jax.random.normal(k_pred, (N, S * S * D), dtype=jnp.float32)
    target = jax.random.uniform(k_tgt, (N, S, S, D), dtype=jnp.float32)
    obj_mask = (jax.random.uniform(k_obj, (N, S, S)) > 0.5).astype(jnp.float32)
    target = target.at[..., 20].set(obj_mask)

    out = jax.jit(yolo_loss)(predictions, target)
    out = jax.block_until_ready(out)

    ref = _yolo_loss_reference(predictions, target)
    assert jnp.allclose(out, ref, rtol=1e-3, atol=1e-2), (out, ref)

    print("KERNEL_OK")
</pallas_src>

<mosaic_0001>
module attributes {stable_mosaic.version = 11 : i64} {
  func.func @_yolo_loss_kernel(%arg0: i32, %arg1: memref<30x128xf32, #tpu.memory_space<vmem>>, %arg2: memref<25x128xf32, #tpu.memory_space<vmem>>, %arg3: memref<1x1x128xf32, #tpu.memory_space<vmem>>) attributes {dimension_semantics = [#tpu.dimension_semantics<parallel>], iteration_bounds = array<i64: 1>, scalar_prefetch = 0 : i64, scratch_operands = 0 : i64, tpu.core_type = #tpu.core_type<tc>, window_params = [{transform_indices = @transform_0, window_bounds = array<i64: 30, 128>}, {transform_indices = @transform_1, window_bounds = array<i64: 25, 128>}, {transform_indices = @transform_2, window_bounds = array<i64: 1, 1, 128>}]} {
    %c0 = arith.constant 0 : index
    %c0_0 = arith.constant 0 : index
    %0 = vector.load %arg1[%c0, %c0_0] : memref<30x128xf32, #tpu.memory_space<vmem>>, vector<20x128xf32>
    %c20 = arith.constant 20 : index
    %c0_1 = arith.constant 0 : index
    %1 = vector.load %arg1[%c20, %c0_1] : memref<30x128xf32, #tpu.memory_space<vmem>>, vector<1x128xf32>
    %c21 = arith.constant 21 : index
    %c0_2 = arith.constant 0 : index
    %2 = vector.load %arg1[%c21, %c0_2] : memref<30x128xf32, #tpu.memory_space<vmem>>, vector<4x128xf32>
    %c25 = arith.constant 25 : index
    %c0_3 = arith.constant 0 : index
    %3 = vector.load %arg1[%c25, %c0_3] : memref<30x128xf32, #tpu.memory_space<vmem>>, vector<1x128xf32>
    %c26 = arith.constant 26 : index
    %c0_4 = arith.constant 0 : index
    %4 = vector.load %arg1[%c26, %c0_4] : memref<30x128xf32, #tpu.memory_space<vmem>>, vector<4x128xf32>
    %c0_5 = arith.constant 0 : index
    %c0_6 = arith.constant 0 : index
    %5 = vector.load %arg2[%c0_5, %c0_6] : memref<25x128xf32, #tpu.memory_space<vmem>>, vector<20x128xf32>
    %c20_7 = arith.constant 20 : index
    %c0_8 = arith.constant 0 : index
    %6 = vector.load %arg2[%c20_7, %c0_8] : memref<25x128xf32, #tpu.memory_space<vmem>>, vector<1x128xf32>
    %c21_9 = arith.constant 21 : index
    %c0_10 = arith.constant 0 : index
    %7 = vector.load %arg2[%c21_9, %c0_10] : memref<25x128xf32, #tpu.memory_space<vmem>>, vector<4x128xf32>
    %8 = vector.extract_strided_slice %2 {offsets = [0, 0], sizes = [1, 128], strides = [1, 1]} : vector<4x128xf32> to vector<1x128xf32>
    %9 = vector.extract_strided_slice %2 {offsets = [2, 0], sizes = [1, 128], strides = [1, 1]} : vector<4x128xf32> to vector<1x128xf32>
    %cst = arith.constant 5.000000e-01 : f32
    %10 = vector.broadcast %cst : f32 to vector<1x128xf32>
    %11 = arith.mulf %10, %9 : vector<1x128xf32>
    %12 = arith.subf %8, %11 : vector<1x128xf32>
    %13 = vector.extract_strided_slice %2 {offsets = [0, 0], sizes = [1, 128], strides = [1, 1]} : vector<4x128xf32> to vector<1x128xf32>
    %14 = vector.extract_strided_slice %2 {offsets = [2, 0], sizes = [1, 128], strides = [1, 1]} : vector<4x128xf32> to vector<1x128xf32>
    %cst_11 = arith.constant 5.000000e-01 : f32
    %15 = vector.broadcast %cst_11 : f32 to vector<1x128xf32>
    %16 = arith.mulf %15, %14 : vector<1x128xf32>
    %17 = arith.addf %13, %16 : vector<1x128xf32>
    %18 = vector.extract_strided_slice %2 {offsets = [1, 0], sizes = [1, 128], strides = [1, 1]} : vector<4x128xf32> to vector<1x128xf32>
    %19 = vector.extract_strided_slice %2 {offsets = [3, 0], sizes = [1, 128], strides = [1, 1]} : vector<4x128xf32> to vector<1x128xf32>
    %cst_12 = arith.constant 5.000000e-01 : f32
    %20 = vector.broadcast %cst_12 : f32 to vector<1x128xf32>
    %21 = arith.mulf %20, %19 : vector<1x128xf32>
    %22 = arith.subf %18, %21 : vector<1x128xf32>
    %23 = vector.extract_strided_slice %2 {offsets = [1, 0], sizes = [1, 128], strides = [1, 1]} : vector<4x128xf32> to vector<1x128xf32>
    %24 = vector.extract_strided_slice %2 {offsets = [3, 0], sizes = [1, 128], strides = [1, 1]} : vector<4x128xf32> to vector<1x128xf32>
    %cst_13 = arith.constant 5.000000e-01 : f32
    %25 = vector.broadcast %cst_13 : f32 to vector<1x128xf32>
    %26 = arith.mulf %25, %24 : vector<1x128xf32>
    %27 = arith.addf %23, %26 : vector<1x128xf32>
    %28 = vector.extract_strided_slice %7 {offsets = [0, 0], sizes = [1, 128], strides = [1, 1]} : vector<4x128xf32> to vector<1x128xf32>
    %29 = vector.extract_strided_slice %7 {offsets = [2, 0], sizes = [1, 128], strides = [1, 1]} : vector<4x128xf32> to vector<1x128xf32>
    %cst_14 = arith.constant 5.000000e-01 : f32
    %30 = vector.broadcast %cst_14 : f32 to vector<1x128xf32>
    %31 = arith.mulf %30, %29 : vector<1x128xf32>
    %32 = arith.subf %28, %31 : vector<1x128xf32>
    %33 = vector.extract_strided_slice %7 {offsets = [0, 0], sizes = [1, 128], strides = [1, 1]} : vector<4x128xf32> to vector<1x128xf32>
    %34 = vector.extract_strided_slice %7 {offsets = [2, 0], sizes = [1, 128], strides = [1, 1]} : vector<4x128xf32> to vector<1x128xf32>
    %cst_15 = arith.constant 5.000000e-01 : f32
    %35 = vector.broadcast %cst_15 : f32 to vector<1x128xf32>
    %36 = arith.mulf %35, %34 : vector<1x128xf32>
    %37 = arith.addf %33, %36 : vector<1x128xf32>
    %38 = vector.extract_strided_slice %7 {offsets = [1, 0], sizes = [1, 128], strides = [1, 1]} : vector<4x128xf32> to vector<1x128xf32>
    %39 = vector.extract_strided_slice %7 {offsets = [3, 0], sizes = [1, 128], strides = [1, 1]} : vector<4x128xf32> to vector<1x128xf32>
    %cst_16 = arith.constant 5.000000e-01 : f32
    %40 = vector.broadcast %cst_16 : f32 to vector<1x128xf32>
    %41 = arith.mulf %40, %39 : vector<1x128xf32>
    %42 = arith.subf %38, %41 : vector<1x128xf32>
    %43 = vector.extract_strided_slice %7 {offsets = [1, 0], sizes = [1, 128], strides = [1, 1]} : vector<4x128xf32> to vector<1x128xf32>
    %44 = vector.extract_strided_slice %7 {offsets = [3, 0], sizes = [1, 128], strides = [1, 1]} : vector<4x128xf32> to vector<1x128xf32>
    %cst_17 = arith.constant 5.000000e-01 : f32
    %45 = vector.broadcast %cst_17 : f32 to vector<1x128xf32>
    %46 = arith.mulf %45, %44 : vector<1x128xf32>
    %47 = arith.addf %43, %46 : vector<1x128xf32>
    %48 = arith.minimumf %17, %37 : vector<1x128xf32>
    %49 = arith.maximumf %12, %32 : vector<1x128xf32>
    %50 = arith.subf %48, %49 : vector<1x128xf32>
    %cst_18 = arith.constant 0.000000e+00 : f32
    %51 = vector.broadcast %cst_18 : f32 to vector<1x128xf32>
    %52 = arith.maximumf %50, %51 : vector<1x128xf32>
    %53 = arith.minimumf %27, %47 : vector<1x128xf32>
    %54 = arith.maximumf %22, %42 : vector<1x128xf32>
    %55 = arith.subf %53, %54 : vector<1x128xf32>
    %cst_19 = arith.constant 0.000000e+00 : f32
    %56 = vector.broadcast %cst_19 : f32 to vector<1x128xf32>
    %57 = arith.maximumf %55, %56 : vector<1x128xf32>
    %58 = arith.mulf %52, %57 : vector<1x128xf32>
    %59 = vector.extract_strided_slice %2 {offsets = [2, 0], sizes = [1, 128], strides = [1, 1]} : vector<4x128xf32> to vector<1x128xf32>
    %60 = vector.extract_strided_slice %2 {offsets = [3, 0], sizes = [1, 128], strides = [1, 1]} : vector<4x128xf32> to vector<1x128xf32>
    %61 = arith.mulf %59, %60 : vector<1x128xf32>
    %62 = math.absf %61 : vector<1x128xf32>
    %63 = vector.extract_strided_slice %7 {offsets = [2, 0], sizes = [1, 128], strides = [1, 1]} : vector<4x128xf32> to vector<1x128xf32>
    %64 = vector.extract_strided_slice %7 {offsets = [3, 0], sizes = [1, 128], strides = [1, 1]} : vector<4x128xf32> to vector<1x128xf32>
    %65 = arith.mulf %63, %64 : vector<1x128xf32>
    %66 = math.absf %65 : vector<1x128xf32>
    %67 = arith.addf %62, %66 : vector<1x128xf32>
    %68 = arith.subf %67, %58 : vector<1x128xf32>
    %69 = vector.extract_strided_slice %4 {offsets = [0, 0], sizes = [1, 128], strides = [1, 1]} : vector<4x128xf32> to vector<1x128xf32>
    %70 = vector.extract_strided_slice %4 {offsets = [2, 0], sizes = [1, 128], strides = [1, 1]} : vector<4x128xf32> to vector<1x128xf32>
    %cst_20 = arith.constant 5.000000e-01 : f32
    %71 = vector.broadcast %cst_20 : f32 to vector<1x128xf32>
    %72 = arith.mulf %71, %70 : vector<1x128xf32>
    %73 = arith.subf %69, %72 : vector<1x128xf32>
    %74 = vector.extract_strided_slice %4 {offsets = [0, 0], sizes = [1, 128], strides = [1, 1]} : vector<4x128xf32> to vector<1x128xf32>
    %75 = vector.extract_strided_slice %4 {offsets = [2, 0], sizes = [1, 128], strides = [1, 1]} : vector<4x128xf32> to vector<1x128xf32>
    %cst_21 = arith.constant 5.000000e-01 : f32
    %76 = vector.broadcast %cst_21 : f32 to vector<1x128xf32>
    %77 = arith.mulf %76, %75 : vector<1x128xf32>
    %78 = arith.addf %74, %77 : vector<1x128xf32>
    %79 = vector.extract_strided_slice %4 {offsets = [1, 0], sizes = [1, 128], strides = [1, 1]} : vector<4x128xf32> to vector<1x128xf32>
    %80 = vector.extract_strided_slice %4 {offsets = [3, 0], sizes = [1, 128], strides = [1, 1]} : vector<4x128xf32> to vector<1x128xf32>
    %cst_22 = arith.constant 5.000000e-01 : f32
    %81 = vector.broadcast %cst_22 : f32 to vector<1x128xf32>
    %82 = arith.mulf %81, %80 : vector<1x128xf32>
    %83 = arith.subf %79, %82 : vector<1x128xf32>
    %84 = vector.extract_strided_slice %4 {offsets = [1, 0], sizes = [1, 128], strides = [1, 1]} : vector<4x128xf32> to vector<1x128xf32>
    %85 = vector.extract_strided_slice %4 {offsets = [3, 0], sizes = [1, 128], strides = [1, 1]} : vector<4x128xf32> to vector<1x128xf32>
    %cst_23 = arith.constant 5.000000e-01 : f32
    %86 = vector.broadcast %cst_23 : f32 to vector<1x128xf32>
    %87 = arith.mulf %86, %85 : vector<1x128xf32>
    %88 = arith.addf %84, %87 : vector<1x128xf32>
    %89 = vector.extract_strided_slice %7 {offsets = [0, 0], sizes = [1, 128], strides = [1, 1]} : vector<4x128xf32> to vector<1x128xf32>
    %90 = vector.extract_strided_slice %7 {offsets = [2, 0], sizes = [1, 128], strides = [1, 1]} : vector<4x128xf32> to vector<1x128xf32>
    %cst_24 = arith.constant 5.000000e-01 : f32
    %91 = vector.broadcast %cst_24 : f32 to vector<1x128xf32>
    %92 = arith.mulf %91, %90 : vector<1x128xf32>
    %93 = arith.subf %89, %92 : vector<1x128xf32>
    %94 = vector.extract_strided_slice %7 {offsets = [0, 0], sizes = [1, 128], strides = [1, 1]} : vector<4x128xf32> to vector<1x128xf32>
    %95 = vector.extract_strided_slice %7 {offsets = [2, 0], sizes = [1, 128], strides = [1, 1]} : vector<4x128xf32> to vector<1x128xf32>
    %cst_25 = arith.constant 5.000000e-01 : f32
    %96 = vector.broadcast %cst_25 : f32 to vector<1x128xf32>
    %97 = arith.mulf %96, %95 : vector<1x128xf32>
    %98 = arith.addf %94, %97 : vector<1x128xf32>
    %99 = vector.extract_strided_slice %7 {offsets = [1, 0], sizes = [1, 128], strides = [1, 1]} : vector<4x128xf32> to vector<1x128xf32>
    %100 = vector.extract_strided_slice %7 {offsets = [3, 0], sizes = [1, 128], strides = [1, 1]} : vector<4x128xf32> to vector<1x128xf32>
    %cst_26 = arith.constant 5.000000e-01 : f32
    %101 = vector.broadcast %cst_26 : f32 to vector<1x128xf32>
    %102 = arith.mulf %101, %100 : vector<1x128xf32>
    %103 = arith.subf %99, %102 : vector<1x128xf32>
    %104 = vector.extract_strided_slice %7 {offsets = [1, 0], sizes = [1, 128], strides = [1, 1]} : vector<4x128xf32> to vector<1x128xf32>
    %105 = vector.extract_strided_slice %7 {offsets = [3, 0], sizes = [1, 128], strides = [1, 1]} : vector<4x128xf32> to vector<1x128xf32>
    %cst_27 = arith.constant 5.000000e-01 : f32
    %106 = vector.broadcast %cst_27 : f32 to vector<1x128xf32>
    %107 = arith.mulf %106, %105 : vector<1x128xf32>
    %108 = arith.addf %104, %107 : vector<1x128xf32>
    %109 = arith.minimumf %78, %98 : vector<1x128xf32>
    %110 = arith.maximumf %73, %93 : vector<1x128xf32>
    %111 = arith.subf %109, %110 : vector<1x128xf32>
    %cst_28 = arith.constant 0.000000e+00 : f32
    %112 = vector.broadcast %cst_28 : f32 to vector<1x128xf32>
    %113 = arith.maximumf %111, %112 : vector<1x128xf32>
    %114 = arith.minimumf %88, %108 : vector<1x128xf32>
    %115 = arith.maximumf %83, %103 : vector<1x128xf32>
    %116 = arith.subf %114, %115 : vector<1x128xf32>
    %cst_29 = arith.constant 0.000000e+00 : f32
    %117 = vector.broadcast %cst_29 : f32 to vector<1x128xf32>
    %118 = arith.maximumf %116, %117 : vector<1x128xf32>
    %119 = arith.mulf %113, %118 : vector<1x128xf32>
    %120 = vector.extract_strided_slice %4 {offsets = [2, 0], sizes = [1, 128], strides = [1, 1]} : vector<4x128xf32> to vector<1x128xf32>
    %121 = vector.extract_strided_slice %4 {offsets = [3, 0], sizes = [1, 128], strides = [1, 1]} : vector<4x128xf32> to vector<1x128xf32>
    %122 = arith.mulf %120, %121 : vector<1x128xf32>
    %123 = math.absf %122 : vector<1x128xf32>
    %124 = vector.extract_strided_slice %7 {offsets = [2, 0], sizes = [1, 128], strides = [1, 1]} : vector<4x128xf32> to vector<1x128xf32>
    %125 = vector.extract_strided_slice %7 {offsets = [3, 0], sizes = [1, 128], strides = [1, 1]} : vector<4x128xf32> to vector<1x128xf32>
    %126 = arith.mulf %124, %125 : vector<1x128xf32>
    %127 = math.absf %126 : vector<1x128xf32>
    %128 = arith.addf %123, %127 : vector<1x128xf32>
    %129 = arith.subf %128, %119 : vector<1x128xf32>
    %cst_30 = arith.constant 9.99999997E-7 : f32
    %130 = vector.broadcast %cst_30 : f32 to vector<1x128xf32>
    %131 = arith.addf %68, %130 : vector<1x128xf32>
    %132 = arith.mulf %119, %131 : vector<1x128xf32>
    %cst_31 = arith.constant 9.99999997E-7 : f32
    %133 = vector.broadcast %cst_31 : f32 to vector<1x128xf32>
    %134 = arith.addf %129, %133 : vector<1x128xf32>
    %135 = arith.mulf %58, %134 : vector<1x128xf32>
    %136 = arith.cmpf ogt, %132, %135 : vector<1x128xf32>
    %137 = arith.mulf %6, %6 : vector<1x128xf32>
    %cst_32 = arith.constant 1.000000e+00 : f32
    %138 = vector.broadcast %cst_32 : f32 to vector<1x128xf32>
    %139 = arith.subf %138, %6 : vector<1x128xf32>
    %140 = arith.mulf %139, %139 : vector<1x128xf32>
    %141 = vector.shape_cast %136 : vector<1x128xi1> to vector<1x128xi1>
    %142 = vector.broadcast %141 : vector<1x128xi1> to vector<4x128xi1>
    %143 = arith.select %142, %4, %2 : vector<4x128xi1>, vector<4x128xf32>
    %144 = vector.extract_strided_slice %143 {offsets = [0, 0], sizes = [2, 128], strides = [1, 1]} : vector<4x128xf32> to vector<2x128xf32>
    %145 = vector.extract_strided_slice %7 {offsets = [0, 0], sizes = [2, 128], strides = [1, 1]} : vector<4x128xf32> to vector<2x128xf32>
    %146 = arith.subf %144, %145 : vector<2x128xf32>
    %147 = arith.mulf %146, %146 : vector<2x128xf32>
    %cst_33 = arith.constant dense<0.000000e+00> : vector<128xf32>
    %148 = vector.multi_reduction <add>, %147, %cst_33 [0] : vector<2x128xf32> to vector<128xf32>
    %149 = vector.shape_cast %148 : vector<128xf32> to vector<1x128xf32>
    %150 = vector.extract_strided_slice %143 {offsets = [2, 0], sizes = [2, 128], strides = [1, 1]} : vector<4x128xf32> to vector<2x128xf32>
    %151 = vector.broadcast %6 : vector<1x128xf32> to vector<2x128xf32>
    %152 = arith.mulf %151, %150 : vector<2x128xf32>
    %cst_34 = arith.constant 9.99999997E-7 : f32
    %153 = vector.broadcast %cst_34 : f32 to vector<2x128xf32>
    %154 = arith.addf %152, %153 : vector<2x128xf32>
    %155 = math.absf %154 : vector<2x128xf32>
    %156 = math.sqrt %155 : vector<2x128xf32>
    %157 = vector.extract_strided_slice %7 {offsets = [2, 0], sizes = [2, 128], strides = [1, 1]} : vector<4x128xf32> to vector<2x128xf32>
    %158 = vector.broadcast %6 : vector<1x128xf32> to vector<2x128xf32>
    %159 = arith.mulf %158, %157 : vector<2x128xf32>
    %160 = math.sqrt %159 : vector<2x128xf32>
    %161 = arith.subf %156, %160 : vector<2x128xf32>
    %162 = arith.mulf %161, %161 : vector<2x128xf32>
    %cst_35 = arith.constant dense<0.000000e+00> : vector<128xf32>
    %163 = vector.multi_reduction <add>, %162, %cst_35 [0] : vector<2x128xf32> to vector<128xf32>
    %164 = vector.shape_cast %163 : vector<128xf32> to vector<1x128xf32>
    %165 = arith.mulf %137, %149 : vector<1x128xf32>
    %166 = arith.addf %165, %164 : vector<1x128xf32>
    %167 = arith.select %136, %3, %1 : vector<1x128xi1>, vector<1x128xf32>
    %168 = arith.subf %167, %6 : vector<1x128xf32>
    %169 = arith.mulf %168, %168 : vector<1x128xf32>
    %170 = arith.subf %1, %6 : vector<1x128xf32>
    %171 = arith.mulf %170, %170 : vector<1x128xf32>
    %172 = arith.subf %3, %6 : vector<1x128xf32>
    %173 = arith.mulf %172, %172 : vector<1x128xf32>
    %174 = arith.addf %171, %173 : vector<1x128xf32>
    %175 = arith.subf %0, %5 : vector<20x128xf32>
    %176 = arith.mulf %175, %175 : vector<20x128xf32>
    %cst_36 = arith.constant dense<0.000000e+00> : vector<128xf32>
    %177 = vector.multi_reduction <add>, %176, %cst_36 [0] : vector<20x128xf32> to vector<128xf32>
    %178 = vector.shape_cast %177 : vector<128xf32> to vector<1x128xf32>
    %cst_37 = arith.constant 5.000000e+00 : f32
    %179 = vector.broadcast %cst_37 : f32 to vector<1x128xf32>
    %180 = arith.mulf %179, %166 : vector<1x128xf32>
    %181 = arith.mulf %137, %169 : vector<1x128xf32>
    %182 = arith.addf %180, %181 : vector<1x128xf32>
    %183 = arith.mulf %140, %174 : vector<1x128xf32>
    %cst_38 = arith.constant 5.000000e-01 : f32
    %184 = vector.broadcast %cst_38 : f32 to vector<1x128xf32>
    %185 = arith.mulf %184, %183 : vector<1x128xf32>
    %186 = arith.addf %182, %185 : vector<1x128xf32>
    %187 = arith.mulf %137, %178 : vector<1x128xf32>
    %188 = arith.addf %186, %187 : vector<1x128xf32>
    %189 = tpu.iota {dimensions = array<i32: 1>} : vector<1x128xi32>
    %c128_i32 = arith.constant 128 : i32
    %190 = arith.muli %arg0, %c128_i32 : i32
    %191 = vector.broadcast %190 : i32 to vector<1x128xi32>
    %192 = arith.addi %189, %191 : vector<1x128xi32>
    %c98_i32 = arith.constant 98 : i32
    %193 = vector.broadcast %c98_i32 : i32 to vector<1x128xi32>
    %194 = arith.cmpi slt, %192, %193 : vector<1x128xi32>
    %cst_39 = arith.constant 0.000000e+00 : f32
    %195 = vector.broadcast %cst_39 : f32 to vector<1x128xf32>
    %196 = arith.select %194, %188, %195 : vector<1x128xi1>, vector<1x128xf32>
    %197 = vector.shape_cast %196 : vector<1x128xf32> to vector<1x1x128xf32>
    %c0_40 = arith.constant 0 : index
    %c0_41 = arith.constant 0 : index
    %c0_42 = arith.constant 0 : index
    %198 = vector.load %arg3[%c0_40, %c0_41, %c0_42] : memref<1x1x128xf32, #tpu.memory_space<vmem>>, vector<1x1x128xf32>
    tpu.vector_store %arg3[%c0_40, %c0_41, %c0_42], %197 {strides = array<i32>} : memref<1x1x128xf32, #tpu.memory_space<vmem>>, vector<1x1x128xf32>,
    return
  }
  func.func @transform_0(%arg0: i32) -> (i32, i32) {
    %c0_i32 = arith.constant 0 : i32
    %c0_i32_0 = arith.constant 0 : i32
    return %c0_i32, %arg0 : i32, i32
  }
  func.func @transform_1(%arg0: i32) -> (i32, i32) {
    %c0_i32 = arith.constant 0 : i32
    %c0_i32_0 = arith.constant 0 : i32
    return %c0_i32, %arg0 : i32, i32
  }
  func.func @transform_2(%arg0: i32) -> (i32, i32, i32) {
    %c0_i32 = arith.constant 0 : i32
    %c0_i32_0 = arith.constant 0 : i32
    %c0_i32_1 = arith.constant 0 : i32
    return %arg0, %c0_i32, %c0_i32_0 : i32, i32, i32
  }
}

</mosaic_0001>

<bundles_post_ra>
// kernel: yolo_loss.1
= control target key start
LH: loop header
LB: loop body
LE: loop exit
PB: predicated region body
PF: predicated region fallthrough
CT: control target
= control target key end

     0   :  { %v203_v51 = vmov 0   ;;  %vm168_vm2 = vcmask 1043456   ;;  %vm102_vm3 = vcmask 1041408   ;;  %s299_s0 = inlined_call_operand.vmem [shape: f32[30,98], index: 0, kind: input, shape index: {}]   ;;  %s300_s1 = inlined_call_operand.vmem [shape: f32[25,98], index: 1, kind: input, shape index: {}]   ;;  %s301_s2 = inlined_call_operand.vmem [shape: f32[1,1,128], index: 2, kind: output, shape index: {}]  }
   0x1   :  { %v222_v0 = vld [vmem:[%s299_s0 + $0x15] sm:$0xf]  ;;  %v227_v1 = vld [vmem:[%s299_s0 + $0x1a] sm:$0xf]  ;;  %v198_v38 = vld [vmem:[%s300_s1 + $0x14] ss:$0 sm:$0xff] }
   0x2   :  { %v23_v2 = vmul.f32 0.5, %v222_v0  ;;  %v233_v3 = vld [vmem:[%s300_s1 + $0x15] sm:$0xf]  ;;  %v44_v6 = vrot.slane %v222_v0, 1  ;;  %v58_v7 = vmul.f32 0.5, %v227_v1  ;;  %v73_v13 = vrot.slane %v227_v1, 1 }
   0x3   :  { %v29_v5 = vmul.f32 0.5, %v233_v3  ;;  %v49_v11 = vrot.slane %v233_v3, 1  ;;  %v253_v41 = vmul.f32 %v198_v38, %v233_v3  ;;  %v11_v53 = vld [vmem:[%s299_s0] sm:$0xff]  ;;  %v12_v55 = vld [vmem:[%s299_s0 + $0x8] sm:$0xff]  ;;  %v13_v59 = vld [vmem:[%s299_s0 + $0x10] sm:$0xf] }
   0x4   :  { %v25_v4 = vrot.slane %v23_v2, 2  ;;  %v60_v12 = vrot.slane %v58_v7, 2  ;;  %v46_v20 = vmul.f32 %v44_v6, %v222_v0  ;;  %v75_v24 = vmul.f32 %v73_v13, %v227_v1  ;;  %v18_v56 = vld [vmem:[%s300_s1] sm:$0xff]  ;;  %v19_v57 = vld [vmem:[%s300_s1 + $0x8] sm:$0xff]  ;;  %v20_v60 = vld [vmem:[%s300_s1 + $0x10] sm:$0xf] }
   0x5   :  { %v31_v10 = vrot.slane %v29_v5, 2  ;;  %v51_v21 = vmul.f32 %v49_v11, %v233_v3  ;;  %199 = vrsqrt.f32 %v253_v41  ;;  %v161_v63 = vsub.f32 %v11_v53, %v18_v56 }
   0x6   :  { %v27_v8 = vsub.f32 %v222_v0, %v25_v4  ;;  %v28_v9 = vadd.f32 %v25_v4, %v222_v0  ;;  %v62_v16 = vsub.f32 %v227_v1, %v60_v12  ;;  %v63_v17 = vadd.f32 %v60_v12, %v227_v1 }
   0x7   :  { %v33_v14 = vsub.f32 %v233_v3, %v31_v10  ;;  %v34_v15 = vadd.f32 %v31_v10, %v233_v3  ;;  %v47_v28 = vand.u32 2147483647, %v46_v20  ;;  %v52_v29 = vand.u32 2147483647, %v51_v21 }
   0x8   :  { %v76_v31 = vand.u32 2147483647, %v75_v24  ;;  %v162_v2 = vsub.f32 %v12_v55, %v19_v57  ;;  %v163_v5 = vsub.f32 %v13_v59, %v20_v60  ;;  %v164_v7 = vmul.f32 %v161_v63, %v161_v63 }
   0x9   :  { %v35_v18 = vmin.f32 %v28_v9, %v34_v15  ;;  %v36_v19 = vmax.f32 %v27_v8, %v33_v14  ;;  %v64_v22 = vmin.f32 %v63_v17, %v34_v15  ;;  %v65_v23 = vmax.f32 %v62_v16, %v33_v14  ;;  %v21_v14 = vld [vmem:[%s300_s1 + $0x14] sm:$0x1] }
   0xa   :  { %v53_v35 = vadd.f32 %v52_v29, %v47_v28  ;;  %v77_v37 = vadd.f32 %v76_v31, %v52_v29  ;;  %v165_v8 = vmul.f32 %v162_v2, %v162_v2  ;;  %v166_v9 = vmul.f32 %v163_v5, %v163_v5 }
   0xb   :  { %v37_v25 = vsub.f32 %v35_v18, %v36_v19  ;;  %v66_v26 = vsub.f32 %v64_v22, %v65_v23  ;;  %v200_v50 = vpop.eup %199  ;;  %v94_v15 = vsub.f32 1.0, %v21_v14  ;;  %vm134_vm4 = vcmp.eq.f32.partialorder %v253_v41, inf }
   0xc   :  { %v128_v58 = vmul.f32 %v200_v50, %v253_v41  ;;  %v167_v11 = vadd.f32 %v165_v8, %v164_v7  ;;  %v169_v13 = vsel %vm168_vm2, %v166_v9, 0.0  ;;  %vm136_vm5 = vcmp.eq.f32.partialorder %v253_v41, 0.0 }
   0xd   :  { %v38_v27 = vmax.f32 %v37_v25, 0.0  ;;  %v67_v30 = vmax.f32 %v66_v26, 0.0  ;;  %v95_v22 = vmul.f32 %v94_v15, %v94_v15 }
   0xe   :  { %v129_v4 = vmul.f32 %v200_v50, %v128_v58  ;;  %v170_v17 = vadd.f32 %v169_v13, %v167_v11  ;;  %v185_v11 = vlaneseq }
   0xf   :  { %v40_v32 = vrot.slane %v38_v27, 1  ;;  %v69_v33 = vrot.slane %v67_v30, 1 }
  0x10   :  { %v130_v12 = vmul.f32 0.5, %v129_v4  ;;  %v171_v19 = vrot.slane %v170_v17, 4 }
  0x11   :  { %v42_v34 = vmul.f32 %v40_v32, %v38_v27  ;;  %v71_v36 = vmul.f32 %v69_v33, %v67_v30  ;;  %v93_v33 = vmul.f32 %v21_v14, %v21_v14 }
  0x12   :  { %v131_v18 = vsub.f32 1.5, %v130_v12  ;;  %v172_v25 = vadd.f32 %v171_v19, %v170_v17 }
  0x13   :  { %v55_v39 = vrot.slane %v42_v34, 6  ;;  %v79_v40 = vrot.slane %v71_v36, 6 }
  0x14   :  { %v132_v31 = vmul.f32 %v200_v50, %v131_v18  ;;  %v173_v32 = vrot.slane %v172_v25, 2 }
  0x15   :  { %v57_v42 = vsub.f32 %v53_v35, %v55_v39  ;;  %v81_v43 = vsub.f32 %v77_v37, %v79_v40 }
  0x16   :  { %v174_v37 = vadd.f32 %v173_v32, %v172_v25 }
  0x17   :  { %v82_v44 = vadd.f32 1e-06, %v57_v42  ;;  %v87_v45 = vadd.f32 1e-06, %v81_v43  ;;  %v133_v42 = vmul.f32 %v132_v31, %v253_v41 }
  0x18   :  { %v175_v43 = vrot.slane %v174_v37, 1 }
  0x19   :  { %v84_v46 = vrot.slane %v82_v44, 2  ;;  %v89_v47 = vrot.slane %v87_v45, 2 }
  0x1b   :  { %v86_v48 = vmul.f32 %v84_v46, %v71_v36  ;;  %v91_v49 = vmul.f32 %v89_v47, %v42_v34  ;;  %v176_v46 = vadd.f32 %v175_v43, %v174_v37  ;;  %v137_v47 = vand.u32 2147483648, %v253_v41 }
  0x1d   :  { %vm92_vm0 = vcmp.gt.f32.partialorder %v86_v48, %v91_v49  ;;  %v135_v49 = vsel %vm134_vm4, %v253_v41, %v133_v42  ;;  %v183_v50 = vmul.f32 %v176_v46, %v93_v33 }
  0x1e   :  { %v96_v52 = vsel %vm92_vm0, 1, %v203_v51 }
  0x1f   :  { %v97_v54 = vperm.slane %v96_v52, 0 }
  0x21   :  { %vm98_vm1 = vcmp.eq.s32.totalorder %v97_v54, 1  ;;  %v138_v54 = vsel %vm136_vm5, %v137_v47, %v135_v49 }
  0x22   :  { %v99_v61 = vsel %vm98_vm1, %v227_v1, %v222_v0  ;;  %v14_v0 = vld [vmem:[%s299_s0 + $0x14] sm:$0x1]  ;;  %v16_v1 = vld [vmem:[%s299_s0 + $0x19] sm:$0x1] }
  0x23   :  { %v111_v62 = vmul.f32 %v198_v38, %v99_v61  ;;  %v100_v16 = vsub.f32 %v99_v61, %v233_v3  ;;  %v156_v20 = vsub.f32 %v14_v0, %v21_v14  ;;  %v158_v21 = vsub.f32 %v16_v1, %v21_v14 }
  0x24   :  { %v153_v24 = vsel %vm92_vm0, %v16_v1, %v14_v0 }
  0x25   :  { %v112_v6 = vadd.f32 1e-06, %v111_v62  ;;  %v101_v23 = vmul.f32 %v100_v16, %v100_v16  ;;  %v154_v27 = vsub.f32 %v153_v24, %v21_v14  ;;  %v157_v28 = vmul.f32 %v156_v20, %v156_v20 }
  0x26   :  { %v159_v29 = vmul.f32 %v158_v21, %v158_v21  ;;  %v186_v14 = vand.u32 127, %v185_v11 }
  0x27   :  { %v113_v10 = vand.u32 2147483647, %v112_v6  ;;  %v155_v3 = vmul.f32 %v154_v27, %v154_v27  ;;  %v103_v35 = vsel %vm102_vm3, %v101_v23, 0.0 }
  0x28   :  { %v160_v34 = vadd.f32 %v159_v29, %v157_v28  ;;  %v104_v44 = vrot.slane %v103_v35, 4  ;;  %vm190_vm8 = vcmp.lt.s32.totalorder %v186_v14, 98 }
  0x29   :  { %201 = vrsqrt.f32 %v113_v10  ;;  %v178_v38 = vmul.f32 %v155_v3, %v93_v33  ;;  %vm121_vm6 = vcmp.eq.f32.partialorder %v113_v10, inf  ;;  %v124_v52 = vand.u32 2147483648, %v113_v10 }
  0x2a   :  { %v180_v39 = vmul.f32 %v160_v34, %v95_v22  ;;  %v105_v51 = vadd.f32 %v104_v44, %v103_v35  ;;  %vm123_vm7 = vcmp.eq.f32.partialorder %v113_v10, 0.0 }
  0x2c   :  { %v106_v56 = vrot.slane %v105_v51, 2  ;;  %v181_v13 = vmul.f32 0.5, %v180_v39 }
  0x2e   :  { %v107_v60 = vadd.f32 %v106_v56, %v105_v51 }
  0x2f   :  { %v202_v26 = vpop.eup %201 }
  0x30   :  { %v115_v30 = vmul.f32 %v202_v26, %v113_v10  ;;  %v108_v63 = vrot.slane %v107_v60, 1 }
  0x32   :  { %v116_v36 = vmul.f32 %v202_v26, %v115_v30  ;;  %v109_v41 = vadd.f32 %v108_v63, %v107_v60 }
  0x34   :  { %v117_v40 = vmul.f32 0.5, %v116_v36  ;;  %v151_v8 = vmul.f32 %v109_v41, %v93_v33 }
  0x36   :  { %v118_v45 = vsub.f32 1.5, %v117_v40 }
  0x38   :  { %v119_v48 = vmul.f32 %v202_v26, %v118_v45 }
  0x3a   :  { %v120_v53 = vmul.f32 %v119_v48, %v113_v10 }
  0x3c   :  { %v122_v55 = vsel %vm121_vm6, %v113_v10, %v120_v53 }
  0x3d   :  { %v125_v57 = vsel %vm123_vm7, %v124_v52, %v122_v55 }
  0x3e   :  { %v139_v58 = vsub.f32 %v125_v57, %v138_v54 }
  0x40   :  { %v140_v59 = vmul.f32 %v139_v58, %v139_v58 }
  0x42   :  { %v142_v61 = vrot.slane %v140_v59, 2 }
  0x44   :  { %v144_v62 = vsel %vm102_vm3, %v142_v61, 0.0 }
  0x45   :  { %v145_v2 = vrot.slane %v144_v62, 4 }
  0x47   :  { %v146_v4 = vadd.f32 %v145_v2, %v144_v62 }
  0x49   :  { %v147_v5 = vrot.slane %v146_v4, 2 }
  0x4b   :  { %v148_v6 = vadd.f32 %v147_v5, %v146_v4 }
  0x4d   :  { %v149_v7 = vrot.slane %v148_v6, 1 }
  0x4f   :  { %v150_v9 = vadd.f32 %v149_v7, %v148_v6 }
  0x51   :  { %v152_v12 = vadd.f32 %v151_v8, %v150_v9 }
  0x53   :  { %v177_v10 = vmul.f32 5.0, %v152_v12 }
  0x55   :  { %v179_v0 = vadd.f32 %v178_v38, %v177_v10 }
  0x57   :  { %v182_v1 = vadd.f32 %v181_v13, %v179_v0 }
  0x59   :  { %v184_v15 = vadd.f32 %v183_v50, %v182_v1 }
  0x5b   :  { %v191_v16 = vsel %vm190_vm8, %v184_v15, 0.0 }
  0x5c   :  { %192 = vst [vmem:[%s301_s2] sm:$0x1] %v191_v16 }

</bundles_post_ra>
